<compile_context>
chip_gen: v7x
topology: tpu7x:2x2x1
jax: 0.10.0
libtpu: 0.0.40
codegen_flags: <defaults>
</compile_context>

<pallas_src>
import jax
import jax.numpy as jnp
from jax.experimental import pallas as pl
from jax.experimental.pallas import tpu as pltpu


def _round_up(x, m):
    return ((x + m - 1) // m) * m


def _cdiv(a, b):
    return -(-a // b)


# ---------------------------------------------------------------------------
# Kernels
# ---------------------------------------------------------------------------
def _resident_kernel(x_ref, w1_ref, b1_ref, w2_ref, b2_ref, o_ref):
    """Weights resident in VMEM; one row tile of x per grid step."""
    h = jnp.dot(x_ref[...], w1_ref[...], preferred_element_type=jnp.float32)
    h = jnp.maximum(h + b1_ref[...], 0.0)               # bias + ReLU in f32
    out = jnp.dot(h.astype(w2_ref.dtype), w2_ref[...],
                  preferred_element_type=jnp.float32)
    o_ref[...] = (out + b2_ref[...]).astype(o_ref.dtype)


def _ktiled_kernel(x_ref, w1_ref, b1_ref, w2_ref, b2_ref, o_ref, h_acc):
    """Fallback when W1 does not fit resident: K-tiled first matmul with an
    f32 accumulator scratch; second matmul + biases on the last K step."""
    k = pl.program_id(1)

    @pl.when(k == 0)
    def _():
        h_acc[...] = jnp.zeros_like(h_acc)

    h_acc[...] += jnp.dot(x_ref[...], w1_ref[...],
                          preferred_element_type=jnp.float32)

    @pl.when(k == pl.num_programs(1) - 1)
    def _():
        h = jnp.maximum(h_acc[...] + b1_ref[...], 0.0).astype(w2_ref.dtype)
        out = jnp.dot(h, w2_ref[...], preferred_element_type=jnp.float32)
        o_ref[...] = (out + b2_ref[...]).astype(o_ref.dtype)


# ---------------------------------------------------------------------------
# One-time parameter packing (hoisted out of the per-call wrapper)
# ---------------------------------------------------------------------------
def prepare_params(w1, b1, w2, b2, *, use_bf16_matmul=False):
    """Pad feature dims to the 128-lane grain and (optionally) cast to bf16.

    Done once so every forward call avoids an extra HBM read+write pass over
    the weights. Zero padding is exact through Linear+ReLU+Linear.
    """
    in_dim = int(w1.shape[0])
    assert w1.shape == (in_dim, in_dim)
    assert w2.shape[0] == in_dim
    out_dim = int(w2.shape[1])

    mxu_dtype = jnp.dtype(jnp.bfloat16 if use_bf16_matmul else jnp.float32)
    in_p = _round_up(in_dim, 128)
    out_p = _round_up(out_dim, 128)

    w1_p = jnp.pad(w1, ((0, in_p - in_dim), (0, in_p - in_dim))).astype(mxu_dtype)
    w2_p = jnp.pad(w2, ((0, in_p - in_dim), (0, out_p - out_dim))).astype(mxu_dtype)
    b1_p = jnp.pad(jnp.reshape(b1, (1, in_dim)),
                   ((0, 0), (0, in_p - in_dim))).astype(jnp.float32)
    b2_p = jnp.pad(jnp.reshape(b2, (1, out_dim)),
                   ((0, 0), (0, out_p - out_dim))).astype(jnp.float32)

    return dict(w1=w1_p, b1=b1_p, w2=w2_p, b2=b2_p,
                in_dim=in_dim, out_dim=out_dim,
                in_p=in_p, out_p=out_p, mxu_dtype=mxu_dtype)


# ---------------------------------------------------------------------------
# VMEM budgeting / tiling helpers
# ---------------------------------------------------------------------------
def _vmem_capacity_bytes():
    try:
        return int(pltpu.get_tpu_info().vmem_capacity_bytes)
    except Exception:
        return 64 * 1024 * 1024  # conservative: v7x per-TensorCore VMEM


def _pick_row_tiles(n, grain, per_row, fixed, budget, tm_cap):
    """Balanced row tiles: pad N only to the sublane grain, keep every tile
    the same size, and (when N allows) split into >= 2 tiles so the 'parallel'
    row axis can occupy both TensorCores on v7x."""
    n_g = _round_up(max(n, 1), grain)
    avail = max(budget - fixed, per_row * grain)
    tm_fit = max(grain, (avail // per_row) // grain * grain)
    tm_eff = max(grain, (min(tm_fit, tm_cap, n_g) // grain) * grain)
    num_tiles = _cdiv(n_g, tm_eff)
    if n_g >= 2 * grain:
        num_tiles = max(num_tiles, 2)  # no-op cost on 1-TC v5e/v6e
    tm = _round_up(_cdiv(n_g, num_tiles), grain)
    n_p = num_tiles * tm
    return tm, num_tiles, n_p


# ---------------------------------------------------------------------------
# Forward wrapper
# ---------------------------------------------------------------------------
def node_predictor(node_embed, params, *, tm_cap=2048, force_k_tiled=False):
    """Fused forward: relu(x @ W1 + b1) @ W2 + b2, with params from
    prepare_params()."""
    n, in_dim = node_embed.shape
    assert in_dim == params["in_dim"]
    in_p, out_p = params["in_p"], params["out_p"]
    out_dim = params["out_dim"]
    mxu_dtype = params["mxu_dtype"]
    out_dtype = node_embed.dtype

    isz = jnp.dtype(mxu_dtype).itemsize
    osz = jnp.dtype(out_dtype).itemsize
    grain = 16 if isz == 2 else 8  # bf16 native tile is (16,128), f32 (8,128)

    vmem_cap = _vmem_capacity_bytes()
    budget = vmem_cap - 8 * 1024 * 1024  # headroom below physical VMEM

    # --- VMEM footprint model (weights single-buffered via pl.Buffered(1)) ---
    resident_weight_bytes = (in_p * in_p + in_p * out_p) * isz + (in_p + out_p) * 4
    use_ktiled = force_k_tiled or (resident_weight_bytes > 0.6 * budget)

    if use_ktiled:
        # Pick the largest tk (multiple of 128 dividing in_p) whose W1 slab
        # (double-buffered) fits a fraction of the budget.
        m = in_p // 128
        tk = 128
        slab_cap = max(budget // 3, 2 * 128 * in_p * isz)
        for d in range(m, 0, -1):
            if m % d == 0 and 2 * (d * 128) * in_p * isz <= slab_cap:
                tk = d * 128
                break
        fixed = ((in_p * out_p) * isz + (in_p + out_p) * 4   # resident W2 + biases
                 + 2 * tk * in_p * isz)                       # dbl-buffered W1 slab
        per_row = (2 * tk * isz          # x tile (double-buffered)
                   + 2 * out_p * osz     # out tile (double-buffered)
                   + in_p * 4            # f32 h accumulator scratch
                   + out_p * 4)          # f32 out before final cast
        if isz == 2:
            per_row += in_p * isz        # bf16 copy of h for the second matmul
    else:
        tk = in_p
        fixed = resident_weight_bytes
        per_row = (2 * in_p * isz + 2 * out_p * osz + in_p * 4 + out_p * 4)
        if isz == 2:
            per_row += in_p * isz

    tm, num_row_tiles, n_p = _pick_row_tiles(n, grain, per_row, fixed, budget, tm_cap)

    # --- activations: pad/cast only when actually needed ----------------------
    need_pad = (n_p != n) or (in_p != in_dim)
    need_cast = jnp.dtype(node_embed.dtype) != jnp.dtype(mxu_dtype)
    if need_pad:
        x_p = jnp.pad(node_embed, ((0, n_p - n), (0, in_p - in_dim)))
        if need_cast:
            x_p = x_p.astype(mxu_dtype)
    elif need_cast:
        x_p = node_embed.astype(mxu_dtype)
    else:
        x_p = node_embed

    # --- cost estimate / compiler params ---------------------------------------
    flops = 2 * n_p * in_p * (in_p + out_p)
    bytes_accessed = int(n_p * in_p * isz                      # x
                         + (in_p * in_p + in_p * out_p) * isz  # W1, W2
                         + (in_p + out_p) * 4                  # biases
                         + n_p * out_p * osz)                  # out
    cost = pl.CostEstimate(flops=flops, transcendentals=0,
                           bytes_accessed=bytes_accessed)

    est_vmem = fixed + tm * per_row
    vmem_limit = int(min(budget, max(2 * est_vmem, 32 * 1024 * 1024)))

    # --- build + run the pallas_call -------------------------------------------
    def _run(single_buffer_weights):
        w_kw = ({"pipeline_mode": pl.Buffered(1)} if single_buffer_weights else {})
        if use_ktiled:
            grid = (num_row_tiles, in_p // tk)
            grid_spec = pl.GridSpec(
                grid=grid,
                in_specs=[
                    pl.BlockSpec((tm, tk), lambda i, k: (i, k)),
                    pl.BlockSpec((tk, in_p), lambda i, k: (k, 0)),
                    pl.BlockSpec((1, in_p), lambda i, k: (0, 0), **w_kw),
                    pl.BlockSpec((in_p, out_p), lambda i, k: (0, 0), **w_kw),
                    pl.BlockSpec((1, out_p), lambda i, k: (0, 0), **w_kw),
                ],
                out_specs=pl.BlockSpec((tm, out_p), lambda i, k: (i, 0)),
                scratch_shapes=[pltpu.VMEM((tm, in_p), jnp.float32)],
            )
            kernel = _ktiled_kernel
            dims = ("parallel", "arbitrary")
        else:
            grid = (num_row_tiles,)
            grid_spec = pl.GridSpec(
                grid=grid,
                in_specs=[
                    pl.BlockSpec((tm, in_p), lambda i: (i, 0)),
                    pl.BlockSpec((in_p, in_p), lambda i: (0, 0), **w_kw),
                    pl.BlockSpec((1, in_p), lambda i: (0, 0), **w_kw),
                    pl.BlockSpec((in_p, out_p), lambda i: (0, 0), **w_kw),
                    pl.BlockSpec((1, out_p), lambda i: (0, 0), **w_kw),
                ],
                out_specs=pl.BlockSpec((tm, out_p), lambda i: (i, 0)),
            )
            kernel = _resident_kernel
            dims = ("parallel",)

        return pl.pallas_call(
            kernel,
            out_shape=jax.ShapeDtypeStruct((n_p, out_p), out_dtype),
            grid_spec=grid_spec,
            compiler_params=pltpu.CompilerParams(
                dimension_semantics=dims, vmem_limit_bytes=vmem_limit),
            cost_estimate=cost,
        )(x_p, params["w1"], params["b1"], params["w2"], params["b2"])

    try:
        out_padded = _run(True)     # single-buffered grid-invariant weights
    except Exception:
        out_padded = _run(False)    # safety fallback: default double-buffering

    # Note: for tiny out_dim a store of the unpadded (n_p, out_dim) output can
    # beat the lane-dense padded store when the kernel is store-bound; measure
    # before switching. Here we keep the lane-dense padded store + slice.
    if n_p == n and out_p == out_dim:
        return out_padded
    return out_padded[:n, :out_dim]


# ---------------------------------------------------------------------------
# Demo / self-check
# ---------------------------------------------------------------------------
if __name__ == "__main__":
    # Small shapes consistent with the module; at this size the kernel is
    # launch-overhead bound -- batch many rows per call in production.
    N, IN_DIM, OUT_DIM = 8, 32, 16

    key = jax.random.PRNGKey(0)
    k_x, k1, k2, k3, k4 = jax.random.split(key, 5)
    bound = 1.0 / (IN_DIM ** 0.5)
    x = jax.random.normal(k_x, (N, IN_DIM), jnp.float32)
    w1 = jax.random.uniform(k1, (IN_DIM, IN_DIM), jnp.float32, -bound, bound)
    b1 = jax.random.uniform(k2, (IN_DIM,), jnp.float32, -bound, bound)
    w2 = jax.random.uniform(k3, (IN_DIM, OUT_DIM), jnp.float32, -bound, bound)
    b2 = jax.random.uniform(k4, (OUT_DIM,), jnp.float32, -bound, bound)

    # Reference in plain JAX (same semantics as the PyTorch module).
    ref = jnp.maximum(x @ w1 + b1, 0.0) @ w2 + b2

    # f32 path (exact semantics of the PyTorch module).
    params_f32 = prepare_params(w1, b1, w2, b2, use_bf16_matmul=False)
    out = jax.block_until_ready(node_predictor(x, params_f32))
    assert out.shape == (N, OUT_DIM)
    assert jnp.allclose(out, ref, atol=1e-5, rtol=1e-5)

    # bf16-MXU path (f32 accumulation; recommended default on v6e/v7x).
    # Inputs are rounded to bf16 before the first matmul, so ReLU thresholds
    # see slightly rounded pre-activations -- hence the loose tolerance.
    params_bf16 = prepare_params(w1, b1, w2, b2, use_bf16_matmul=True)
    out_bf16 = jax.block_until_ready(node_predictor(x, params_bf16))
    assert out_bf16.shape == (N, OUT_DIM)
    assert jnp.allclose(out_bf16, ref, atol=1e-1, rtol=1e-1)

    # K-tiled fallback path (used automatically when W1 cannot stay resident).
    out_kt = jax.block_until_ready(
        node_predictor(x, params_f32, force_k_tiled=True))
    assert out_kt.shape == (N, OUT_DIM)
    assert jnp.allclose(out_kt, ref, atol=1e-5, rtol=1e-5)

    print("KERNEL_OK")
</pallas_src>

<mosaic_0001>
module attributes {stable_mosaic.version = 11 : i64} {
  func.func @_resident_kernel(%arg0: i32, %arg1: memref<8x128xf32, #tpu.memory_space<vmem>>, %arg2: memref<128x128xf32, #tpu.memory_space<vmem>>, %arg3: memref<1x128xf32, #tpu.memory_space<vmem>>, %arg4: memref<128x128xf32, #tpu.memory_space<vmem>>, %arg5: memref<1x128xf32, #tpu.memory_space<vmem>>, %arg6: memref<8x128xf32, #tpu.memory_space<vmem>>) attributes {dimension_semantics = [#tpu.dimension_semantics<parallel>], iteration_bounds = array<i64: 1>, scalar_prefetch = 0 : i64, scratch_operands = 0 : i64, tpu.core_type = #tpu.core_type<tc>, window_params = [{transform_indices = @transform_0, window_bounds = array<i64: 8, 128>}, {pipeline_mode = #tpu.pipeline_mode<synchronous>, transform_indices = @transform_1, window_bounds = array<i64: 128, 128>}, {pipeline_mode = #tpu.pipeline_mode<synchronous>, transform_indices = @transform_2, window_bounds = array<i64: 1, 128>}, {pipeline_mode = #tpu.pipeline_mode<synchronous>, transform_indices = @transform_3, window_bounds = array<i64: 128, 128>}, {pipeline_mode = #tpu.pipeline_mode<synchronous>, transform_indices = @transform_4, window_bounds = array<i64: 1, 128>}, {transform_indices = @transform_5, window_bounds = array<i64: 8, 128>}]} {
    %c0 = arith.constant 0 : index
    %c0_0 = arith.constant 0 : index
    %0 = vector.load %arg1[%c0, %c0_0] : memref<8x128xf32, #tpu.memory_space<vmem>>, vector<8x128xf32>
    %c0_1 = arith.constant 0 : index
    %c0_2 = arith.constant 0 : index
    %1 = vector.load %arg2[%c0_1, %c0_2] : memref<128x128xf32, #tpu.memory_space<vmem>>, vector<128x128xf32>
    %cst = arith.constant dense<0.000000e+00> : vector<8x128xf32>
    %2 = tpu.matmul %0, %1, %cst {dimension_numbers = #tpu.dot_dimension_numbers<[1], [0], [0], [1], [0, 0, 1, 1], [], []>} : vector<8x128xf32>, vector<128x128xf32>, vector<8x128xf32> -> vector<8x128xf32>
    %c0_3 = arith.constant 0 : index
    %c0_4 = arith.constant 0 : index
    %3 = vector.load %arg3[%c0_3, %c0_4] : memref<1x128xf32, #tpu.memory_space<vmem>>, vector<1x128xf32>
    %4 = vector.broadcast %3 : vector<1x128xf32> to vector<8x128xf32>
    %5 = arith.addf %2, %4 : vector<8x128xf32>
    %cst_5 = arith.constant 0.000000e+00 : f32
    %6 = vector.broadcast %cst_5 : f32 to vector<8x128xf32>
    %7 = arith.maximumf %5, %6 : vector<8x128xf32>
    %c0_6 = arith.constant 0 : index
    %c0_7 = arith.constant 0 : index
    %8 = vector.load %arg4[%c0_6, %c0_7] : memref<128x128xf32, #tpu.memory_space<vmem>>, vector<128x128xf32>
    %cst_8 = arith.constant dense<0.000000e+00> : vector<8x128xf32>
    %9 = tpu.matmul %7, %8, %cst_8 {dimension_numbers = #tpu.dot_dimension_numbers<[1], [0], [0], [1], [0, 0, 1, 1], [], []>} : vector<8x128xf32>, vector<128x128xf32>, vector<8x128xf32> -> vector<8x128xf32>
    %c0_9 = arith.constant 0 : index
    %c0_10 = arith.constant 0 : index
    %10 = vector.load %arg5[%c0_9, %c0_10] : memref<1x128xf32, #tpu.memory_space<vmem>>, vector<1x128xf32>
    %11 = vector.broadcast %10 : vector<1x128xf32> to vector<8x128xf32>
    %12 = arith.addf %9, %11 : vector<8x128xf32>
    %c0_11 = arith.constant 0 : index
    %c0_12 = arith.constant 0 : index
    %13 = vector.load %arg6[%c0_11, %c0_12] : memref<8x128xf32, #tpu.memory_space<vmem>>, vector<8x128xf32>
    tpu.vector_store %arg6[%c0_11, %c0_12], %12 {strides = array<i32>} : memref<8x128xf32, #tpu.memory_space<vmem>>, vector<8x128xf32>,
    return
  }
  func.func @transform_0(%arg0: i32) -> (i32, i32) {
    %c0_i32 = arith.constant 0 : i32
    %c0_i32_0 = arith.constant 0 : i32
    return %arg0, %c0_i32 : i32, i32
  }
  func.func @transform_1(%arg0: i32) -> (i32, i32) {
    %c0_i32 = arith.constant 0 : i32
    %c0_i32_0 = arith.constant 0 : i32
    %c0_i32_1 = arith.constant 0 : i32
    return %c0_i32, %c0_i32_0 : i32, i32
  }
  func.func @transform_2(%arg0: i32) -> (i32, i32) {
    %c0_i32 = arith.constant 0 : i32
    %c0_i32_0 = arith.constant 0 : i32
    %c0_i32_1 = arith.constant 0 : i32
    return %c0_i32, %c0_i32_0 : i32, i32
  }
  func.func @transform_3(%arg0: i32) -> (i32, i32) {
    %c0_i32 = arith.constant 0 : i32
    %c0_i32_0 = arith.constant 0 : i32
    %c0_i32_1 = arith.constant 0 : i32
    return %c0_i32, %c0_i32_0 : i32, i32
  }
  func.func @transform_4(%arg0: i32) -> (i32, i32) {
    %c0_i32 = arith.constant 0 : i32
    %c0_i32_0 = arith.constant 0 : i32
    %c0_i32_1 = arith.constant 0 : i32
    return %c0_i32, %c0_i32_0 : i32, i32
  }
  func.func @transform_5(%arg0: i32) -> (i32, i32) {
    %c0_i32 = arith.constant 0 : i32
    %c0_i32_0 = arith.constant 0 : i32
    return %arg0, %c0_i32 : i32, i32
  }
}

module attributes {stable_mosaic.version = 11 : i64} {
  func.func @_resident_kernel(%arg0: i32, %arg1: memref<8x128xf32, #tpu.memory_space<vmem>>, %arg2: memref<128x128xf32, #tpu.memory_space<vmem>>, %arg3: memref<1x128xf32, #tpu.memory_space<vmem>>, %arg4: memref<128x128xf32, #tpu.memory_space<vmem>>, %arg5: memref<1x128xf32, #tpu.memory_space<vmem>>, %arg6: memref<8x128xf32, #tpu.memory_space<vmem>>) attributes {dimension_semantics = [#tpu.dimension_semantics<parallel>], iteration_bounds = array<i64: 1>, scalar_prefetch = 0 : i64, scratch_operands = 0 : i64, tpu.core_type = #tpu.core_type<tc>, window_params = [{transform_indices = @transform_0, window_bounds = array<i64: 8, 128>}, {pipeline_mode = #tpu.pipeline_mode<synchronous>, transform_indices = @transform_1, window_bounds = array<i64: 128, 128>}, {pipeline_mode = #tpu.pipeline_mode<synchronous>, transform_indices = @transform_2, window_bounds = array<i64: 1, 128>}, {pipeline_mode = #tpu.pipeline_mode<synchronous>, transform_indices = @transform_3, window_bounds = array<i64: 128, 128>}, {pipeline_mode = #tpu.pipeline_mode<synchronous>, transform_indices = @transform_4, window_bounds = array<i64: 1, 128>}, {transform_indices = @transform_5, window_bounds = array<i64: 8, 128>}]} {
    %c0 = arith.constant 0 : index
    %c0_0 = arith.constant 0 : index
    %0 = vector.load %arg1[%c0, %c0_0] : memref<8x128xf32, #tpu.memory_space<vmem>>, vector<8x128xf32>
    %c0_1 = arith.constant 0 : index
    %c0_2 = arith.constant 0 : index
    %1 = vector.load %arg2[%c0_1, %c0_2] : memref<128x128xf32, #tpu.memory_space<vmem>>, vector<128x128xf32>
    %cst = arith.constant dense<0.000000e+00> : vector<8x128xf32>
    %2 = tpu.matmul %0, %1, %cst {dimension_numbers = #tpu.dot_dimension_numbers<[1], [0], [0], [1], [0, 0, 1, 1], [], []>} : vector<8x128xf32>, vector<128x128xf32>, vector<8x128xf32> -> vector<8x128xf32>
    %c0_3 = arith.constant 0 : index
    %c0_4 = arith.constant 0 : index
    %3 = vector.load %arg3[%c0_3, %c0_4] : memref<1x128xf32, #tpu.memory_space<vmem>>, vector<1x128xf32>
    %4 = vector.broadcast %3 : vector<1x128xf32> to vector<8x128xf32>
    %5 = arith.addf %2, %4 : vector<8x128xf32>
    %cst_5 = arith.constant 0.000000e+00 : f32
    %6 = vector.broadcast %cst_5 : f32 to vector<8x128xf32>
    %7 = arith.maximumf %5, %6 : vector<8x128xf32>
    %c0_6 = arith.constant 0 : index
    %c0_7 = arith.constant 0 : index
    %8 = vector.load %arg4[%c0_6, %c0_7] : memref<128x128xf32, #tpu.memory_space<vmem>>, vector<128x128xf32>
    %cst_8 = arith.constant dense<0.000000e+00> : vector<8x128xf32>
    %9 = tpu.matmul %7, %8, %cst_8 {dimension_numbers = #tpu.dot_dimension_numbers<[1], [0], [0], [1], [0, 0, 1, 1], [], []>} : vector<8x128xf32>, vector<128x128xf32>, vector<8x128xf32> -> vector<8x128xf32>
    %c0_9 = arith.constant 0 : index
    %c0_10 = arith.constant 0 : index
    %10 = vector.load %arg5[%c0_9, %c0_10] : memref<1x128xf32, #tpu.memory_space<vmem>>, vector<1x128xf32>
    %11 = vector.broadcast %10 : vector<1x128xf32> to vector<8x128xf32>
    %12 = arith.addf %9, %11 : vector<8x128xf32>
    %c0_11 = arith.constant 0 : index
    %c0_12 = arith.constant 0 : index
    %13 = vector.load %arg6[%c0_11, %c0_12] : memref<8x128xf32, #tpu.memory_space<vmem>>, vector<8x128xf32>
    tpu.vector_store %arg6[%c0_11, %c0_12], %12 {strides = array<i32>} : memref<8x128xf32, #tpu.memory_space<vmem>>, vector<8x128xf32>,
    return
  }
  func.func @transform_0(%arg0: i32) -> (i32, i32) {
    %c0_i32 = arith.constant 0 : i32
    %c0_i32_0 = arith.constant 0 : i32
    return %arg0, %c0_i32 : i32, i32
  }
  func.func @transform_1(%arg0: i32) -> (i32, i32) {
    %c0_i32 = arith.constant 0 : i32
    %c0_i32_0 = arith.constant 0 : i32
    %c0_i32_1 = arith.constant 0 : i32
    return %c0_i32, %c0_i32_0 : i32, i32
  }
  func.func @transform_2(%arg0: i32) -> (i32, i32) {
    %c0_i32 = arith.constant 0 : i32
    %c0_i32_0 = arith.constant 0 : i32
    %c0_i32_1 = arith.constant 0 : i32
    return %c0_i32, %c0_i32_0 : i32, i32
  }
  func.func @transform_3(%arg0: i32) -> (i32, i32) {
    %c0_i32 = arith.constant 0 : i32
    %c0_i32_0 = arith.constant 0 : i32
    %c0_i32_1 = arith.constant 0 : i32
    return %c0_i32, %c0_i32_0 : i32, i32
  }
  func.func @transform_4(%arg0: i32) -> (i32, i32) {
    %c0_i32 = arith.constant 0 : i32
    %c0_i32_0 = arith.constant 0 : i32
    %c0_i32_1 = arith.constant 0 : i32
    return %c0_i32, %c0_i32_0 : i32, i32
  }
  func.func @transform_5(%arg0: i32) -> (i32, i32) {
    %c0_i32 = arith.constant 0 : i32
    %c0_i32_0 = arith.constant 0 : i32
    return %arg0, %c0_i32 : i32, i32
  }
}

</mosaic_0001>

<bundles_post_ra>
// kernel: tpu_custom_call.1
= control target key start
LH: loop header
LB: loop body
LE: loop exit
PB: predicated region body
PF: predicated region fallthrough
CT: control target
= control target key end

     0   :  { %10 = vsyncpa [#allocation3], 0  ;;  %s637_s0 = inlined_call_operand.hbm [shape: f32[8,128], index: 0, kind: input, shape index: {}]   ;;  %s638_s1 = inlined_call_operand.hbm [shape: f32[128,128], index: 1, kind: input, shape index: {}]   ;;  %s639_s2 = inlined_call_operand.vmem [shape: f32[1,128], index: 2, kind: input, shape index: {}]   ;;  %s640_s3 = inlined_call_operand.hbm [shape: f32[128,128], index: 3, kind: input, shape index: {}]   ;;  %s641_s4 = inlined_call_operand.vmem [shape: f32[1,128], index: 4, kind: input, shape index: {}]   ;;  %s642_s5 = inlined_call_operand.hbm [shape: f32[8,128], index: 5, kind: output, shape index: {}]  }
   0x1   :  { %11 = vsyncpa [#allocation6], 0 }
   0x2   :  { %12 = vsyncpa [#allocation4], 0  ;;  %s522_s18 = smov [#allocation5]   ;;  %s428_s22 = scalar_lea.hbm %s638_s1, 2048 }
   0x3   :  { %s28_s19 = sshll.u32 %s522_s18, 4  ;;  %p429_p0 = scmp.ne.s32.totalorder %s638_s1, %s428_s22  ;;  %s29_s19 = int_to_ptr.vmem [resolvable:$true] %s28_s19 }
   0x4   :  { %p432_p1 = scmp.lt.u32.totalorder %s428_s22, %s638_s1 }
   0x6   :  { %p434_p2 = pnand %p432_p1, %p429_p0 }
   0x8   :  { %437 = shalt.err (!%p434_p2)
}
   0x9   :  { %s438_s27 = scalar_lea.vmem %s29_s19, 2048  ;;  %p443_p4 = scmp.lt.s32.totalorder %s29_s19, %s29_s19 }
   0xa   :  { %p439_p3 = scmp.ne.s32.totalorder %s29_s19, %s438_s27  ;;  %p444_p5 = scmp.lt.s32.totalorder %s438_s27, %s438_s27 }
   0xc   :  { %p445_p6 = por %p444_p5, %p443_p4 }
   0xe   :  { %p446_p7 = pnand %p445_p6, %p439_p3 }
  0x10   :  { %449 = shalt.err (!%p446_p7)
}
  0x11   :  { %s523_s28 = smov 128   ;;  %s524_s29 = smov 8  }
  0x12   :  { %34 = dma.hbm_to_vmem [thread:$0]  %s638_s1, 2048, %s29_s19, [#allocation6], %s523_s28, %s523_s28, %s524_s29  }
  0x13   :  { %s525_s7 = smov [#allocation2]   ;;  %s526_s9 = smov [#allocation7]  }
  0x14   :  { %s19_s8 = sshll.u32 %s525_s7, 4  ;;  %s42_s10 = sshll.u32 %s526_s9, 4  ;;  %s20_s8 = int_to_ptr.vmem [resolvable:$true] %s19_s8  ;;  %s43_s10 = int_to_ptr.vmem [resolvable:$true] %s42_s10 }
  0x15   :  { %s450_s13 = scalar_lea.hbm %s637_s0, 128 }
  0x16   :  { %p451_p8 = scmp.ne.s32.totalorder %s637_s0, %s450_s13  ;;  %p454_p9 = scmp.lt.u32.totalorder %s450_s13, %s637_s0 }
  0x18   :  { %p456_p10 = pnand %p454_p9, %p451_p8 }
  0x1a   :  { %459 = shalt.err (!%p456_p10)
}
  0x1b   :  { %s460_s1 = scalar_lea.vmem %s20_s8, 128  ;;  %p465_p12 = scmp.lt.s32.totalorder %s20_s8, %s20_s8 }
  0x1c   :  { %p461_p11 = scmp.ne.s32.totalorder %s20_s8, %s460_s1  ;;  %p466_p13 = scmp.lt.s32.totalorder %s460_s1, %s460_s1 }
  0x1e   :  { %p467_p0 = por %p466_p13, %p465_p12 }
  0x20   :  { %p468_p1 = pnand %p467_p0, %p461_p11 }
  0x22   :  { %471 = shalt.err (!%p468_p1)
}
  0x23   :  { %22 = dma.hbm_to_vmem [thread:$0]  %s637_s0, 128, %s20_s8, [#allocation3]  }
  0x24   :  { %s472_s22 = scalar_lea.hbm %s640_s3, 2048 }
  0x25   :  { %p473_p2 = scmp.ne.s32.totalorder %s640_s3, %s472_s22  ;;  %p476_p3 = scmp.lt.u32.totalorder %s472_s22, %s640_s3 }
  0x27   :  { %p478_p4 = pnand %p476_p3, %p473_p2 }
  0x29   :  { %481 = shalt.err (!%p478_p4)
}
  0x2a   :  { %s482_s27 = scalar_lea.vmem %s43_s10, 2048  ;;  %p487_p6 = scmp.lt.s32.totalorder %s43_s10, %s43_s10 }
  0x2b   :  { %p483_p5 = scmp.ne.s32.totalorder %s43_s10, %s482_s27  ;;  %p488_p7 = scmp.lt.s32.totalorder %s482_s27, %s482_s27 }
  0x2d   :  { %p489_p8 = por %p488_p7, %p487_p6 }
  0x2f   :  { %p490_p9 = pnand %p489_p8, %p483_p5 }
  0x31   :  { %493 = shalt.err (!%p490_p9)
}
  0x32   :  { %48 = dma.hbm_to_vmem [thread:$0]  %s640_s3, 2048, %s43_s10, [#allocation6], %s523_s28, %s523_s28, %s524_s29  }
  0x33   :  { %516 = dma.done.wait [#allocation3], 128  }
  0x34   :  { %517 = vsyncadd [#allocation3], 4294967168 }
  0x35   :  { %518 = dma.done.wait [#allocation6], 4096  }
  0x36   :  { %519 = vsyncadd [#allocation6], 4294963200  ;;  %v527_v0 = vmov 0.0|0.0   ;;  %vm528_vm0 = vmmov 0   ;;  %v529_v1 = vmov 0.0   ;;  %v61_v2 = vld [vmem:[#allocation5] sm:$0xff] }
  0x37   :  { %371 = vmatprep.subr.bf16.mxu0 %v527_v0  ;;  %333 = vmatprep.mubr.msk.f32.mxu0 %vm528_vm0, %v529_v1  ;;  %v62_v3 = vld [vmem:[#allocation5 + $0x8] sm:$0xff]  ;;  %v63_v4 = vld [vmem:[#allocation5 + $0x10] sm:$0xff]  ;;  %v64_v6 = vld [vmem:[#allocation5 + $0x18] sm:$0xff]  ;;  %s530_s7 = smov [#allocation8]  }
  0x38   :  { %395 = vmatprep.subr.bf16.mxu1 %v527_v0  ;;  %368 = vmatprep.mubr.msk.f32.mxu1 %vm528_vm0, %v529_v1  ;;  %v372_v5 = vpack.c.bf16 %v62_v3, %v61_v2  ;;  %v375_v7 = vpack.c.bf16 %v64_v6, %v63_v4  ;;  %v65_v8 = vld [vmem:[#allocation5 + $0x20] sm:$0xff]  ;;  %v66_v9 = vld [vmem:[#allocation5 + $0x28] sm:$0xff]  ;;  %v157_v12 = vld [vmem:[#allocation7 + $0x10] sm:$0xff]  ;;  %s255_s8 = sshll.u32 %s530_s7, 4  ;;  %s256_s8 = int_to_ptr.vmem [resolvable:$true] %s255_s8 }
  0x39   :  { %v155_v10 = vld [vmem:[#allocation7] sm:$0xff]  ;;  %v156_v11 = vld [vmem:[#allocation7 + $0x8] sm:$0xff]  ;;  %v158_v13 = vld [vmem:[#allocation7 + $0x18] sm:$0xff]  ;;  %v378_v14 = vpack.c.bf16 %v66_v9, %v65_v8  ;;  %s494_s9 = scalar_lea.vmem %s256_s8, 128  ;;  %p499_p11 = scmp.lt.s32.totalorder %s256_s8, %s256_s8 }
  0x3a   :  { %373 = vmatpush3.bf16.msra.mxu0 %v372_v5  ;;  %v396_v15 = vpack.c.bf16 %v156_v11, %v155_v10  ;;  %v67_v16 = vld [vmem:[#allocation5 + $0x30] sm:$0xff]  ;;  %v68_v17 = vld [vmem:[#allocation5 + $0x38] sm:$0xff]  ;;  %v399_v18 = vpack.c.bf16 %v158_v13, %v157_v12  ;;  %v159_v19 = vld [vmem:[#allocation7 + $0x20] sm:$0xff]  ;;  %p495_p10 = scmp.ne.s32.totalorder %s256_s8, %s494_s9  ;;  %p500_p12 = scmp.lt.s32.totalorder %s494_s9, %s494_s9 }
  0x3b   :  { %374 = vmatprep.subr.bf16.mxu0 %v527_v0  ;;  %v160_v20 = vld [vmem:[#allocation7 + $0x28] sm:$0xff]  ;;  %v381_v21 = vpack.c.bf16 %v68_v17, %v67_v16  ;;  %v69_v22 = vld [vmem:[#allocation5 + $0x40] sm:$0xff]  ;;  %v161_v25 = vld [vmem:[#allocation7 + $0x30] sm:$0xff] }
  0x3c   :  { %397 = vmatpush3.bf16.msra.mxu1 %v396_v15  ;;  %v70_v23 = vld [vmem:[#allocation5 + $0x48] sm:$0xff]  ;;  %v402_v24 = vpack.c.bf16 %v160_v20, %v159_v19  ;;  %v162_v26 = vld [vmem:[#allocation7 + $0x38] sm:$0xff]  ;;  %v71_v28 = vld [vmem:[#allocation5 + $0x50] sm:$0xff]  ;;  %p501_p13 = por %p500_p12, %p499_p11 }
  0x3d   :  { %398 = vmatprep.subr.bf16.mxu1 %v527_v0  ;;  %v384_v27 = vpack.c.bf16 %v70_v23, %v69_v22  ;;  %v72_v29 = vld [vmem:[#allocation5 + $0x58] sm:$0xff]  ;;  %v405_v30 = vpack.c.bf16 %v162_v26, %v161_v25  ;;  %v163_v31 = vld [vmem:[#allocation7 + $0x40] sm:$0xff]  ;;  %v164_v32 = vld [vmem:[#allocation7 + $0x48] sm:$0xff] }
  0x3e   :  { %376 = vmatpush3.bf16.msra.mxu0 %v375_v7  ;;  %v387_v33 = vpack.c.bf16 %v72_v29, %v71_v28  ;;  %v73_v34 = vld [vmem:[#allocation5 + $0x60] sm:$0xff]  ;;  %v74_v35 = vld [vmem:[#allocation5 + $0x68] sm:$0xff]  ;;  %v408_v36 = vpack.c.bf16 %v164_v32, %v163_v31  ;;  %v165_v37 = vld [vmem:[#allocation7 + $0x50] sm:$0xff]  ;;  %p502_p0 = pnand %p501_p13, %p495_p10 }
  0x3f   :  { %377 = vmatprep.subr.bf16.mxu0 %v527_v0  ;;  %v166_v38 = vld [vmem:[#allocation7 + $0x58] sm:$0xff]  ;;  %v390_v39 = vpack.c.bf16 %v74_v35, %v73_v34  ;;  %v75_v40 = vld [vmem:[#allocation5 + $0x70] sm:$0xff]  ;;  %v167_v43 = vld [vmem:[#allocation7 + $0x60] sm:$0xff] }
  0x40   :  { %400 = vmatpush3.bf16.msra.mxu1 %v399_v18  ;;  %v76_v41 = vld [vmem:[#allocation5 + $0x78] sm:$0xff]  ;;  %v411_v42 = vpack.c.bf16 %v166_v38, %v165_v37  ;;  %v168_v44 = vld [vmem:[#allocation7 + $0x68] sm:$0xff]  ;;  %v169_v48 = vld [vmem:[#allocation7 + $0x70] sm:$0xff] }
  0x41   :  { %401 = vmatprep.subr.bf16.mxu1 %v527_v0  ;;  %v393_v45 = vpack.c.bf16 %v76_v41, %v75_v40  ;;  %v414_v46 = vpack.c.bf16 %v168_v44, %v167_v43  ;;  %v60_v47 = vld [vmem:[#allocation2] sm:$0xff] }
  0x42   :  { %379 = vmatpush3.bf16.msra.mxu0 %v378_v14  ;;  %v170_v49 = vld [vmem:[#allocation7 + $0x78] sm:$0xff] }
  0x43   :  { %380 = vmatprep.subr.bf16.mxu0 %v527_v0  ;;  %v417_v50 = vpack.c.bf16 %v170_v49, %v169_v48  ;;  %v265_v51 = vld [vmem:[%s639_s2] ss:$0 sm:$0xff] }
  0x44   :  { %403 = vmatpush3.bf16.msra.mxu1 %v402_v24  ;;  %v266_v56 = vld [vmem:[%s641_s4] ss:$0 sm:$0xff] }
  0x45   :  { %404 = vmatprep.subr.bf16.mxu1 %v527_v0 }
  0x46   :  { %382 = vmatpush3.bf16.msra.mxu0 %v381_v21 }
  0x47   :  { %383 = vmatprep.subr.bf16.mxu0 %v527_v0 }
  0x48   :  { %406 = vmatpush3.bf16.msra.mxu1 %v405_v30 }
  0x49   :  { %407 = vmatprep.subr.bf16.mxu1 %v527_v0 }
  0x4a   :  { %385 = vmatpush3.bf16.msra.mxu0 %v384_v27 }
  0x4b   :  { %386 = vmatprep.subr.bf16.mxu0 %v527_v0 }
  0x4c   :  { %409 = vmatpush3.bf16.msra.mxu1 %v408_v36 }
  0x4d   :  { %410 = vmatprep.subr.bf16.mxu1 %v527_v0 }
  0x4e   :  { %388 = vmatpush3.bf16.msra.mxu0 %v387_v33 }
  0x4f   :  { %389 = vmatprep.subr.bf16.mxu0 %v527_v0 }
  0x50   :  { %412 = vmatpush3.bf16.msra.mxu1 %v411_v42 }
  0x51   :  { %413 = vmatprep.subr.bf16.mxu1 %v527_v0 }
  0x52   :  { %391 = vmatpush3.bf16.msra.mxu0 %v390_v39 }
  0x53   :  { %392 = vmatprep.subr.bf16.mxu0 %v527_v0 }
  0x54   :  { %415 = vmatpush3.bf16.msra.mxu1 %v414_v46 }
  0x55   :  { %416 = vmatprep.subr.bf16.mxu1 %v527_v0 }
  0x56   :  { %394 = vmatpush3.bf16.msra.mxu0 %v393_v45 }
  0x58   :  { %418 = vmatpush3.bf16.msra.mxu1 %v417_v50 }
  0x59   :  { %334 = vmatmul.mubr.f32.vlgmr.msra.gmra.mrb[0].mxu0 %v60_v47 }
 0x12c   :  { %v150_v52 = vpop.f32.mrb[0].mxu0 }
 0x12d   :  { %v151_v53 = vadd.f32 %v265_v51, %v150_v52  ;;  %v335_v54 = vpop.f32.mrb[1].mxu0 }
 0x12f   :  { %v154_v55 = vmax.f32 %v151_v53, 0.0 }
 0x131   :  { %369 = vmatmul.mubr.f32.vlgmr.msra.gmra.mrb[0].mxu1 %v154_v55 }
 0x204   :  { %v244_v57 = vpop.f32.mrb[0].mxu1 }
 0x205   :  { %v245_v58 = vadd.f32 %v266_v56, %v244_v57  ;;  %v370_v59 = vpop.f32.mrb[1].mxu1 }
 0x207   :  { %248 = vst [vmem:[#allocation8] sm:$0xff] %v245_v58 }
 0x208   :  { %505 = shalt.err (!%p502_p0)
}
 0x209   :  { %s506_s11 = scalar_lea.hbm %s642_s5, 128 }
 0x20a   :  { %p507_p1 = scmp.ne.s32.totalorder %s642_s5, %s506_s11  ;;  %p510_p2 = scmp.lt.u32.totalorder %s506_s11, %s642_s5 }
 0x20c   :  { %p512_p3 = pnand %p510_p2, %p507_p1 }
 0x20e   :  { %515 = shalt.err (!%p512_p3)
}
 0x20f   :  { %258 = dma.vmem_to_hbm [thread:$0]  %s256_s8, 128, %s642_s5, [#allocation4]  }
 0x210   :  { %520 = dma.done.wait [#allocation4], 128  }
 0x211   :  { %521 = vsyncadd [#allocation4], 4294967168 }
 0x212   :  { %262 = vsyncpa [#allocation3], 1 }
 0x213   :  { %263 = vsyncpa [#allocation6], 1 }
 0x214   :  { %264 = vsyncpa [#allocation4], 1 }

// kernel: tpu_custom_call.1
= control target key start
LH: loop header
LB: loop body
LE: loop exit
PB: predicated region body
PF: predicated region fallthrough
CT: control target
= control target key end

     0   :  { %10 = vsyncpa [#allocation3], 0  ;;  %s637_s0 = inlined_call_operand.hbm [shape: f32[8,128], index: 0, kind: input, shape index: {}]   ;;  %s638_s1 = inlined_call_operand.hbm [shape: f32[128,128], index: 1, kind: input, shape index: {}]   ;;  %s639_s2 = inlined_call_operand.vmem [shape: f32[1,128], index: 2, kind: input, shape index: {}]   ;;  %s640_s3 = inlined_call_operand.hbm [shape: f32[128,128], index: 3, kind: input, shape index: {}]   ;;  %s641_s4 = inlined_call_operand.vmem [shape: f32[1,128], index: 4, kind: input, shape index: {}]   ;;  %s642_s5 = inlined_call_operand.hbm [shape: f32[8,128], index: 5, kind: output, shape index: {}]  }
   0x1   :  { %11 = vsyncpa [#allocation6], 0 }
   0x2   :  { %12 = vsyncpa [#allocation4], 0  ;;  %s522_s18 = smov [#allocation5]   ;;  %s428_s22 = scalar_lea.hbm %s638_s1, 2048 }
   0x3   :  { %s28_s19 = sshll.u32 %s522_s18, 4  ;;  %p429_p0 = scmp.ne.s32.totalorder %s638_s1, %s428_s22  ;;  %s29_s19 = int_to_ptr.vmem [resolvable:$true] %s28_s19 }
   0x4   :  { %p432_p1 = scmp.lt.u32.totalorder %s428_s22, %s638_s1 }
   0x6   :  { %p434_p2 = pnand %p432_p1, %p429_p0 }
   0x8   :  { %437 = shalt.err (!%p434_p2)
}
   0x9   :  { %s438_s27 = scalar_lea.vmem %s29_s19, 2048  ;;  %p443_p4 = scmp.lt.s32.totalorder %s29_s19, %s29_s19 }
   0xa   :  { %p439_p3 = scmp.ne.s32.totalorder %s29_s19, %s438_s27  ;;  %p444_p5 = scmp.lt.s32.totalorder %s438_s27, %s438_s27 }
   0xc   :  { %p445_p6 = por %p444_p5, %p443_p4 }
   0xe   :  { %p446_p7 = pnand %p445_p6, %p439_p3 }
  0x10   :  { %449 = shalt.err (!%p446_p7)
}
  0x11   :  { %s523_s28 = smov 128   ;;  %s524_s29 = smov 8  }
  0x12   :  { %34 = dma.hbm_to_vmem [thread:$0]  %s638_s1, 2048, %s29_s19, [#allocation6], %s523_s28, %s523_s28, %s524_s29  }
  0x13   :  { %s525_s7 = smov [#allocation2]   ;;  %s526_s9 = smov [#allocation7]  }
  0x14   :  { %s19_s8 = sshll.u32 %s525_s7, 4  ;;  %s42_s10 = sshll.u32 %s526_s9, 4  ;;  %s20_s8 = int_to_ptr.vmem [resolvable:$true] %s19_s8  ;;  %s43_s10 = int_to_ptr.vmem [resolvable:$true] %s42_s10 }
  0x15   :  { %s450_s13 = scalar_lea.hbm %s637_s0, 128 }
  0x16   :  { %p451_p8 = scmp.ne.s32.totalorder %s637_s0, %s450_s13  ;;  %p454_p9 = scmp.lt.u32.totalorder %s450_s13, %s637_s0 }
  0x18   :  { %p456_p10 = pnand %p454_p9, %p451_p8 }
  0x1a   :  { %459 = shalt.err (!%p456_p10)
}
  0x1b   :  { %s460_s1 = scalar_lea.vmem %s20_s8, 128  ;;  %p465_p12 = scmp.lt.s32.totalorder %s20_s8, %s20_s8 }
  0x1c   :  { %p461_p11 = scmp.ne.s32.totalorder %s20_s8, %s460_s1  ;;  %p466_p13 = scmp.lt.s32.totalorder %s460_s1, %s460_s1 }
  0x1e   :  { %p467_p0 = por %p466_p13, %p465_p12 }
  0x20   :  { %p468_p1 = pnand %p467_p0, %p461_p11 }
  0x22   :  { %471 = shalt.err (!%p468_p1)
}
  0x23   :  { %22 = dma.hbm_to_vmem [thread:$0]  %s637_s0, 128, %s20_s8, [#allocation3]  }
  0x24   :  { %s472_s22 = scalar_lea.hbm %s640_s3, 2048 }
  0x25   :  { %p473_p2 = scmp.ne.s32.totalorder %s640_s3, %s472_s22  ;;  %p476_p3 = scmp.lt.u32.totalorder %s472_s22, %s640_s3 }
  0x27   :  { %p478_p4 = pnand %p476_p3, %p473_p2 }
  0x29   :  { %481 = shalt.err (!%p478_p4)
}
  0x2a   :  { %s482_s27 = scalar_lea.vmem %s43_s10, 2048  ;;  %p487_p6 = scmp.lt.s32.totalorder %s43_s10, %s43_s10 }
  0x2b   :  { %p483_p5 = scmp.ne.s32.totalorder %s43_s10, %s482_s27  ;;  %p488_p7 = scmp.lt.s32.totalorder %s482_s27, %s482_s27 }
  0x2d   :  { %p489_p8 = por %p488_p7, %p487_p6 }
  0x2f   :  { %p490_p9 = pnand %p489_p8, %p483_p5 }
  0x31   :  { %493 = shalt.err (!%p490_p9)
}
  0x32   :  { %48 = dma.hbm_to_vmem [thread:$0]  %s640_s3, 2048, %s43_s10, [#allocation6], %s523_s28, %s523_s28, %s524_s29  }
  0x33   :  { %516 = dma.done.wait [#allocation3], 128  }
  0x34   :  { %517 = vsyncadd [#allocation3], 4294967168 }
  0x35   :  { %518 = dma.done.wait [#allocation6], 4096  }
  0x36   :  { %519 = vsyncadd [#allocation6], 4294963200  ;;  %v527_v0 = vmov 0.0|0.0   ;;  %vm528_vm0 = vmmov 0   ;;  %v529_v1 = vmov 0.0   ;;  %v61_v2 = vld [vmem:[#allocation5] sm:$0xff] }
  0x37   :  { %371 = vmatprep.subr.bf16.mxu0 %v527_v0  ;;  %333 = vmatprep.mubr.msk.f32.mxu0 %vm528_vm0, %v529_v1  ;;  %v62_v3 = vld [vmem:[#allocation5 + $0x8] sm:$0xff]  ;;  %v63_v4 = vld [vmem:[#allocation5 + $0x10] sm:$0xff]  ;;  %v64_v6 = vld [vmem:[#allocation5 + $0x18] sm:$0xff]  ;;  %s530_s7 = smov [#allocation8]  }
  0x38   :  { %395 = vmatprep.subr.bf16.mxu1 %v527_v0  ;;  %368 = vmatprep.mubr.msk.f32.mxu1 %vm528_vm0, %v529_v1  ;;  %v372_v5 = vpack.c.bf16 %v62_v3, %v61_v2  ;;  %v375_v7 = vpack.c.bf16 %v64_v6, %v63_v4  ;;  %v65_v8 = vld [vmem:[#allocation5 + $0x20] sm:$0xff]  ;;  %v66_v9 = vld [vmem:[#allocation5 + $0x28] sm:$0xff]  ;;  %v157_v12 = vld [vmem:[#allocation7 + $0x10] sm:$0xff]  ;;  %s255_s8 = sshll.u32 %s530_s7, 4  ;;  %s256_s8 = int_to_ptr.vmem [resolvable:$true] %s255_s8 }
  0x39   :  { %v155_v10 = vld [vmem:[#allocation7] sm:$0xff]  ;;  %v156_v11 = vld [vmem:[#allocation7 + $0x8] sm:$0xff]  ;;  %v158_v13 = vld [vmem:[#allocation7 + $0x18] sm:$0xff]  ;;  %v378_v14 = vpack.c.bf16 %v66_v9, %v65_v8  ;;  %s494_s9 = scalar_lea.vmem %s256_s8, 128  ;;  %p499_p11 = scmp.lt.s32.totalorder %s256_s8, %s256_s8 }
  0x3a   :  { %373 = vmatpush3.bf16.msra.mxu0 %v372_v5  ;;  %v396_v15 = vpack.c.bf16 %v156_v11, %v155_v10  ;;  %v67_v16 = vld [vmem:[#allocation5 + $0x30] sm:$0xff]  ;;  %v68_v17 = vld [vmem:[#allocation5 + $0x38] sm:$0xff]  ;;  %v399_v18 = vpack.c.bf16 %v158_v13, %v157_v12  ;;  %v159_v19 = vld [vmem:[#allocation7 + $0x20] sm:$0xff]  ;;  %p495_p10 = scmp.ne.s32.totalorder %s256_s8, %s494_s9  ;;  %p500_p12 = scmp.lt.s32.totalorder %s494_s9, %s494_s9 }
  0x3b   :  { %374 = vmatprep.subr.bf16.mxu0 %v527_v0  ;;  %v160_v20 = vld [vmem:[#allocation7 + $0x28] sm:$0xff]  ;;  %v381_v21 = vpack.c.bf16 %v68_v17, %v67_v16  ;;  %v69_v22 = vld [vmem:[#allocation5 + $0x40] sm:$0xff]  ;;  %v161_v25 = vld [vmem:[#allocation7 + $0x30] sm:$0xff] }
  0x3c   :  { %397 = vmatpush3.bf16.msra.mxu1 %v396_v15  ;;  %v70_v23 = vld [vmem:[#allocation5 + $0x48] sm:$0xff]  ;;  %v402_v24 = vpack.c.bf16 %v160_v20, %v159_v19  ;;  %v162_v26 = vld [vmem:[#allocation7 + $0x38] sm:$0xff]  ;;  %v71_v28 = vld [vmem:[#allocation5 + $0x50] sm:$0xff]  ;;  %p501_p13 = por %p500_p12, %p499_p11 }
  0x3d   :  { %398 = vmatprep.subr.bf16.mxu1 %v527_v0  ;;  %v384_v27 = vpack.c.bf16 %v70_v23, %v69_v22  ;;  %v72_v29 = vld [vmem:[#allocation5 + $0x58] sm:$0xff]  ;;  %v405_v30 = vpack.c.bf16 %v162_v26, %v161_v25  ;;  %v163_v31 = vld [vmem:[#allocation7 + $0x40] sm:$0xff]  ;;  %v164_v32 = vld [vmem:[#allocation7 + $0x48] sm:$0xff] }
  0x3e   :  { %376 = vmatpush3.bf16.msra.mxu0 %v375_v7  ;;  %v387_v33 = vpack.c.bf16 %v72_v29, %v71_v28  ;;  %v73_v34 = vld [vmem:[#allocation5 + $0x60] sm:$0xff]  ;;  %v74_v35 = vld [vmem:[#allocation5 + $0x68] sm:$0xff]  ;;  %v408_v36 = vpack.c.bf16 %v164_v32, %v163_v31  ;;  %v165_v37 = vld [vmem:[#allocation7 + $0x50] sm:$0xff]  ;;  %p502_p0 = pnand %p501_p13, %p495_p10 }
  0x3f   :  { %377 = vmatprep.subr.bf16.mxu0 %v527_v0  ;;  %v166_v38 = vld [vmem:[#allocation7 + $0x58] sm:$0xff]  ;;  %v390_v39 = vpack.c.bf16 %v74_v35, %v73_v34  ;;  %v75_v40 = vld [vmem:[#allocation5 + $0x70] sm:$0xff]  ;;  %v167_v43 = vld [vmem:[#allocation7 + $0x60] sm:$0xff] }
  0x40   :  { %400 = vmatpush3.bf16.msra.mxu1 %v399_v18  ;;  %v76_v41 = vld [vmem:[#allocation5 + $0x78] sm:$0xff]  ;;  %v411_v42 = vpack.c.bf16 %v166_v38, %v165_v37  ;;  %v168_v44 = vld [vmem:[#allocation7 + $0x68] sm:$0xff]  ;;  %v169_v48 = vld [vmem:[#allocation7 + $0x70] sm:$0xff] }
  0x41   :  { %401 = vmatprep.subr.bf16.mxu1 %v527_v0  ;;  %v393_v45 = vpack.c.bf16 %v76_v41, %v75_v40  ;;  %v414_v46 = vpack.c.bf16 %v168_v44, %v167_v43  ;;  %v60_v47 = vld [vmem:[#allocation2] sm:$0xff] }
  0x42   :  { %379 = vmatpush3.bf16.msra.mxu0 %v378_v14  ;;  %v170_v49 = vld [vmem:[#allocation7 + $0x78] sm:$0xff] }
  0x43   :  { %380 = vmatprep.subr.bf16.mxu0 %v527_v0  ;;  %v417_v50 = vpack.c.bf16 %v170_v49, %v169_v48  ;;  %v265_v51 = vld [vmem:[%s639_s2] ss:$0 sm:$0xff] }
  0x44   :  { %403 = vmatpush3.bf16.msra.mxu1 %v402_v24  ;;  %v266_v56 = vld [vmem:[%s641_s4] ss:$0 sm:$0xff] }
  0x45   :  { %404 = vmatprep.subr.bf16.mxu1 %v527_v0 }
  0x46   :  { %382 = vmatpush3.bf16.msra.mxu0 %v381_v21 }
  0x47   :  { %383 = vmatprep.subr.bf16.mxu0 %v527_v0 }
  0x48   :  { %406 = vmatpush3.bf16.msra.mxu1 %v405_v30 }
  0x49   :  { %407 = vmatprep.subr.bf16.mxu1 %v527_v0 }
  0x4a   :  { %385 = vmatpush3.bf16.msra.mxu0 %v384_v27 }
  0x4b   :  { %386 = vmatprep.subr.bf16.mxu0 %v527_v0 }
  0x4c   :  { %409 = vmatpush3.bf16.msra.mxu1 %v408_v36 }
  0x4d   :  { %410 = vmatprep.subr.bf16.mxu1 %v527_v0 }
  0x4e   :  { %388 = vmatpush3.bf16.msra.mxu0 %v387_v33 }
  0x4f   :  { %389 = vmatprep.subr.bf16.mxu0 %v527_v0 }
  0x50   :  { %412 = vmatpush3.bf16.msra.mxu1 %v411_v42 }
  0x51   :  { %413 = vmatprep.subr.bf16.mxu1 %v527_v0 }
  0x52   :  { %391 = vmatpush3.bf16.msra.mxu0 %v390_v39 }
  0x53   :  { %392 = vmatprep.subr.bf16.mxu0 %v527_v0 }
  0x54   :  { %415 = vmatpush3.bf16.msra.mxu1 %v414_v46 }
  0x55   :  { %416 = vmatprep.subr.bf16.mxu1 %v527_v0 }
  0x56   :  { %394 = vmatpush3.bf16.msra.mxu0 %v393_v45 }
  0x58   :  { %418 = vmatpush3.bf16.msra.mxu1 %v417_v50 }
  0x59   :  { %334 = vmatmul.mubr.f32.vlgmr.msra.gmra.mrb[0].mxu0 %v60_v47 }
 0x12c   :  { %v150_v52 = vpop.f32.mrb[0].mxu0 }
 0x12d   :  { %v151_v53 = vadd.f32 %v265_v51, %v150_v52  ;;  %v335_v54 = vpop.f32.mrb[1].mxu0 }
 0x12f   :  { %v154_v55 = vmax.f32 %v151_v53, 0.0 }
 0x131   :  { %369 = vmatmul.mubr.f32.vlgmr.msra.gmra.mrb[0].mxu1 %v154_v55 }
 0x204   :  { %v244_v57 = vpop.f32.mrb[0].mxu1 }
 0x205   :  { %v245_v58 = vadd.f32 %v266_v56, %v244_v57  ;;  %v370_v59 = vpop.f32.mrb[1].mxu1 }
 0x207   :  { %248 = vst [vmem:[#allocation8] sm:$0xff] %v245_v58 }
 0x208   :  { %505 = shalt.err (!%p502_p0)
}
 0x209   :  { %s506_s11 = scalar_lea.hbm %s642_s5, 128 }
 0x20a   :  { %p507_p1 = scmp.ne.s32.totalorder %s642_s5, %s506_s11  ;;  %p510_p2 = scmp.lt.u32.totalorder %s506_s11, %s642_s5 }
 0x20c   :  { %p512_p3 = pnand %p510_p2, %p507_p1 }
 0x20e   :  { %515 = shalt.err (!%p512_p3)
}
 0x20f   :  { %258 = dma.vmem_to_hbm [thread:$0]  %s256_s8, 128, %s642_s5, [#allocation4]  }
 0x210   :  { %520 = dma.done.wait [#allocation4], 128  }
 0x211   :  { %521 = vsyncadd [#allocation4], 4294967168 }
 0x212   :  { %262 = vsyncpa [#allocation3], 1 }
 0x213   :  { %263 = vsyncpa [#allocation6], 1 }
 0x214   :  { %264 = vsyncpa [#allocation4], 1 }

</bundles_post_ra>
